<compile_context>
chip_gen: v7x
topology: tpu7x:2x2x1
jax: 0.10.0
libtpu: 0.0.40
codegen_flags: <defaults>
</compile_context>

<pallas_src>
import jax
import jax.numpy as jnp
from jax import lax
from jax.experimental import pallas as pl
from jax.experimental.pallas import tpu as pltpu


def _cdiv(a, b):
    return (a + b - 1) // b


def _round_up(v, m):
    return _cdiv(v, m) * m


def _pick_tile(dim, max_tile, gran):
    """Tile size (multiple of `gran`, <= max(max_tile, gran)) that minimizes
    padding of `dim` while keeping the per-block sizes balanced."""
    padded_min = _round_up(dim, gran)
    if padded_min <= max_tile:
        return padded_min                       # single block, zero extra waste
    nblocks = _cdiv(padded_min, max_tile)
    return _round_up(_cdiv(padded_min, nblocks), gran)


# Contract the last dim of x (tm, tk) with the last dim of w (tn, tk): x @ w.T.
_DN_TRANS_B = (((1,), (1,)), ((), ()))


def _linear_kernel_single_k(x_ref, w_ref, o_ref):
    # Whole K in one block: MXU result goes straight to the output tile.
    o_ref[...] = lax.dot_general(
        x_ref[...], w_ref[...], dimension_numbers=_DN_TRANS_B,
        preferred_element_type=jnp.float32,
    ).astype(o_ref.dtype)


def _linear_kernel_multi_k(x_ref, w_ref, o_ref, acc_ref):
    # K is the innermost ("arbitrary") grid axis: accumulate in f32 VMEM.
    @pl.when(pl.program_id(2) == 0)
    def _():
        acc_ref[...] = jnp.zeros_like(acc_ref)

    acc_ref[...] += lax.dot_general(
        x_ref[...], w_ref[...], dimension_numbers=_DN_TRANS_B,
        preferred_element_type=jnp.float32,
    )

    @pl.when(pl.program_id(2) == pl.num_programs(2) - 1)
    def _():
        o_ref[...] = acc_ref[...].astype(o_ref.dtype)


class TextCNNLinearPallas:
    """Bias-free nn.Linear (out = x @ W.T) as a tiled Pallas TPU matmul.

    The weight (a fixed parameter) is prepared exactly once at construction:
    cast to the compute dtype and zero-padded to the tile grid, kept in its
    native (out_features, in_features) layout so no transpose is ever
    materialized. Per-call work touches only x.
    """

    def __init__(self, weight, *, compute_dtype=jnp.bfloat16,
                 tm_max=512, tn_max=1024, tk_max=1024):
        N, K = weight.shape
        self.N, self.K = N, K
        self.compute_dtype = jnp.dtype(compute_dtype)
        self.tm_max = tm_max

        # N lands in the output lane dimension -> 128-granular, lane-dense vst.
        tn = _pick_tile(N, tn_max, 128)
        # Megacore / 2-TC awareness: keep >= 2 blocks along the parallel N axis
        # whenever N allows it, so one v7x TensorCore is not left idle at small
        # batch sizes (single M block).
        if _round_up(N, tn) // tn == 1 and tn >= 256:
            tn = _round_up(_cdiv(tn, 2), 128)
        tk = _pick_tile(K, tk_max, 128)

        self.tn, self.tk = tn, tk
        self.Np = _round_up(N, tn)
        self.Kp = _round_up(K, tk)
        self.grid_n = self.Np // tn
        self.grid_k = self.Kp // tk

        # One-time weight prep (cast + pad; native (N, K) layout, no transpose).
        w = weight.astype(self.compute_dtype)
        if (self.Np, self.Kp) != (N, K):
            w = jnp.pad(w, ((0, self.Np - N), (0, self.Kp - K)))
        self.w_prepared = w

    def __call__(self, x):
        B, K = x.shape
        assert K == self.K, "in_features mismatch between x and weight"
        out_dtype = x.dtype
        tn, tk = self.tn, self.tk

        # Batch tile: multiple of 8, balanced to minimize padding waste.
        tm = _pick_tile(B, self.tm_max, 8)
        Bp = _round_up(B, tm)
        grid_m = Bp // tm

        xc = x.astype(self.compute_dtype)
        if (Bp, self.Kp) != (B, K):
            xc = jnp.pad(xc, ((0, Bp - B), (0, self.Kp - K)))

        op_bytes = self.compute_dtype.itemsize
        out_bytes = jnp.dtype(out_dtype).itemsize

        # VMEM budget from the actual double-buffered tile footprint — never
        # the whole physical VMEM (v7x only has 64 MiB per TensorCore).
        footprint = (2 * (tm * tk + tk * tn) * op_bytes   # double-buffered inputs
                     + 2 * tm * tn * out_bytes            # double-buffered output
                     + tm * tn * 4)                       # f32 accumulator
        vmem_limit = min(max(footprint + (4 << 20), 16 << 20), 48 << 20)

        cost = pl.CostEstimate(
            flops=2 * B * self.N * K,
            transcendentals=0,
            bytes_accessed=(B * K + self.N * K) * op_bytes
                           + B * self.N * out_bytes,
        )

        if self.grid_k == 1:
            # Whole reduction fits in one K block: no scratch, 2-D grid.
            grid = (grid_m, self.grid_n)
            kernel = _linear_kernel_single_k
            in_specs = [
                pl.BlockSpec((tm, tk), lambda i, j: (i, 0)),
                pl.BlockSpec((tn, tk), lambda i, j: (j, 0)),
            ]
            out_specs = pl.BlockSpec((tm, tn), lambda i, j: (i, j))
            scratch_shapes = ()
            semantics = ("parallel", "parallel")
        else:
            grid = (grid_m, self.grid_n, self.grid_k)
            kernel = _linear_kernel_multi_k
            in_specs = [
                pl.BlockSpec((tm, tk), lambda i, j, k: (i, k)),
                pl.BlockSpec((tn, tk), lambda i, j, k: (j, k)),
            ]
            out_specs = pl.BlockSpec((tm, tn), lambda i, j, k: (i, j))
            scratch_shapes = (pltpu.VMEM((tm, tn), jnp.float32),)
            semantics = ("parallel", "parallel", "arbitrary")

        out_padded = pl.pallas_call(
            kernel,
            out_shape=jax.ShapeDtypeStruct((Bp, self.Np), out_dtype),
            grid=grid,
            in_specs=in_specs,
            out_specs=out_specs,
            scratch_shapes=scratch_shapes,
            compiler_params=pltpu.CompilerParams(
                dimension_semantics=semantics,
                vmem_limit_bytes=vmem_limit,
            ),
            cost_estimate=cost,
        )(xc, self.w_prepared)

        # Strip zero padding back to the logical output shape.
        return out_padded[:B, :self.N]


if __name__ == "__main__":
    # Small shapes consistent with the module's forward: x (batch, in_features).
    batch = 8
    in_features = 32
    out_features = 64

    key = jax.random.PRNGKey(0)
    kx, kw = jax.random.split(key)

    x = jax.random.normal(kx, (batch, in_features), dtype=jnp.float32)
    # Deterministic weight mimicking nn.Linear's (out_features, in_features)
    # parameter (uniform in [-1/sqrt(in), 1/sqrt(in)]); bias=False.
    bound = 1.0 / (in_features ** 0.5)
    w = jax.random.uniform(
        kw, (out_features, in_features), dtype=jnp.float32,
        minval=-bound, maxval=bound,
    )

    ref = x @ w.T

    # Default path: bf16 operands (f32 accumulation). Weight prepped once.
    layer_bf16 = TextCNNLinearPallas(w)
    out_bf16 = jax.block_until_ready(layer_bf16(x))
    assert out_bf16.shape == (batch, out_features)
    assert jnp.allclose(out_bf16, ref, atol=5e-2, rtol=5e-2)

    # f32 operand path (tight correctness check).
    layer_f32 = TextCNNLinearPallas(w, compute_dtype=jnp.float32)
    out_f32 = jax.block_until_ready(layer_f32(x))
    assert out_f32.shape == (batch, out_features)
    assert jnp.allclose(out_f32, ref, atol=1e-5, rtol=1e-5)

    print("KERNEL_OK")
</pallas_src>

<mosaic_0001>
module attributes {stable_mosaic.version = 11 : i64} {
  func.func @_linear_kernel_single_k(%arg0: i32, %arg1: i32, %arg2: memref<8x128xbf16, #tpu.memory_space<vmem>>, %arg3: memref<128x128xbf16, #tpu.memory_space<vmem>>, %arg4: memref<8x128xf32, #tpu.memory_space<vmem>>) attributes {dimension_semantics = [#tpu.dimension_semantics<parallel>, #tpu.dimension_semantics<parallel>], iteration_bounds = array<i64: 1, 1>, scalar_prefetch = 0 : i64, scratch_operands = 0 : i64, tpu.core_type = #tpu.core_type<tc>, window_params = [{transform_indices = @transform_0, window_bounds = array<i64: 8, 128>}, {transform_indices = @transform_1, window_bounds = array<i64: 128, 128>}, {transform_indices = @transform_2, window_bounds = array<i64: 8, 128>}]} {
    %c0 = arith.constant 0 : index
    %c0_0 = arith.constant 0 : index
    %0 = vector.load %arg2[%c0, %c0_0] : memref<8x128xbf16, #tpu.memory_space<vmem>>, vector<8x128xbf16>
    %c0_1 = arith.constant 0 : index
    %c0_2 = arith.constant 0 : index
    %1 = vector.load %arg3[%c0_1, %c0_2] : memref<128x128xbf16, #tpu.memory_space<vmem>>, vector<128x128xbf16>
    %cst = arith.constant dense<0.000000e+00> : vector<8x128xf32>
    %2 = tpu.matmul %0, %1, %cst {dimension_numbers = #tpu.dot_dimension_numbers<[1], [1], [0], [0], [0, 0, 1, 0], [], []>} : vector<8x128xbf16>, vector<128x128xbf16>, vector<8x128xf32> -> vector<8x128xf32>
    %c0_3 = arith.constant 0 : index
    %c0_4 = arith.constant 0 : index
    %3 = vector.load %arg4[%c0_3, %c0_4] : memref<8x128xf32, #tpu.memory_space<vmem>>, vector<8x128xf32>
    tpu.vector_store %arg4[%c0_3, %c0_4], %2 {strides = array<i32>} : memref<8x128xf32, #tpu.memory_space<vmem>>, vector<8x128xf32>,
    return
  }
  func.func @transform_0(%arg0: i32, %arg1: i32) -> (i32, i32) {
    %c0_i32 = arith.constant 0 : i32
    %c0_i32_0 = arith.constant 0 : i32
    return %arg0, %c0_i32 : i32, i32
  }
  func.func @transform_1(%arg0: i32, %arg1: i32) -> (i32, i32) {
    %c0_i32 = arith.constant 0 : i32
    %c0_i32_0 = arith.constant 0 : i32
    return %arg1, %c0_i32 : i32, i32
  }
  func.func @transform_2(%arg0: i32, %arg1: i32) -> (i32, i32) {
    %c0_i32 = arith.constant 0 : i32
    return %arg0, %arg1 : i32, i32
  }
}

</mosaic_0001>

<bundles_post_ra>
// kernel: tpu_custom_call.1
= control target key start
LH: loop header
LB: loop body
LE: loop exit
PB: predicated region body
PF: predicated region fallthrough
CT: control target
= control target key end

     0   :  { %7 = vsyncpa [#allocation3], 0  ;;  %s350_s0 = inlined_call_operand.hbm [shape: bf16[8,128], index: 0, kind: input, shape index: {}]   ;;  %s351_s1 = inlined_call_operand.hbm [shape: bf16[128,128], index: 1, kind: input, shape index: {}]   ;;  %s352_s2 = inlined_call_operand.hbm [shape: f32[8,128], index: 2, kind: output, shape index: {}]  }
   0x1   :  { %8 = vsyncpa [#allocation6], 0 }
   0x2   :  { %9 = vsyncpa [#allocation4], 0  ;;  %s285_s9 = smov [#allocation2]   ;;  %s286_s11 = smov [#allocation5]  }
   0x3   :  { %s16_s10 = sshll.u32 %s285_s9, 4  ;;  %s25_s12 = sshll.u32 %s286_s11, 4  ;;  %s17_s10 = int_to_ptr.vmem [resolvable:$true] %s16_s10  ;;  %s307_s12 = int_to_ptr.vmem [resolvable:$true] %s25_s12 }
   0x4   :  { %s213_s15 = scalar_lea.hbm %s350_s0, 64 }
   0x5   :  { %p214_p0 = scmp.ne.s32.totalorder %s350_s0, %s213_s15  ;;  %p217_p1 = scmp.lt.u32.totalorder %s213_s15, %s350_s0 }
   0x7   :  { %p219_p2 = pnand %p217_p1, %p214_p0 }
   0x9   :  { %222 = shalt.err (!%p219_p2)
}
   0xa   :  { %s223_s20 = scalar_lea.vmem %s17_s10, 64  ;;  %p228_p4 = scmp.lt.s32.totalorder %s17_s10, %s17_s10 }
   0xb   :  { %p224_p3 = scmp.ne.s32.totalorder %s17_s10, %s223_s20  ;;  %p229_p5 = scmp.lt.s32.totalorder %s223_s20, %s223_s20 }
   0xd   :  { %p230_p6 = por %p229_p5, %p228_p4 }
   0xf   :  { %p231_p7 = pnand %p230_p6, %p224_p3 }
  0x11   :  { %234 = shalt.err (!%p231_p7)
}
  0x12   :  { %19 = dma.hbm_to_vmem [thread:$0]  %s350_s0, 64, %s17_s10, [#allocation3]  }
  0x13   :  { %s235_s25 = scalar_lea.hbm %s351_s1, 1024 }
  0x14   :  { %p236_p8 = scmp.ne.s32.totalorder %s351_s1, %s235_s25  ;;  %p239_p9 = scmp.lt.u32.totalorder %s235_s25, %s351_s1 }
  0x16   :  { %p241_p10 = pnand %p239_p9, %p236_p8 }
  0x18   :  { %244 = shalt.err (!%p241_p10)
}
  0x19   :  { %s245_s30 = scalar_lea.vmem %s307_s12, 1024  ;;  %p250_p12 = scmp.lt.s32.totalorder %s307_s12, %s307_s12 }
  0x1a   :  { %p246_p11 = scmp.ne.s32.totalorder %s307_s12, %s245_s30  ;;  %p251_p13 = scmp.lt.s32.totalorder %s245_s30, %s245_s30 }
  0x1c   :  { %p252_p0 = por %p251_p13, %p250_p12 }
  0x1e   :  { %p253_p1 = pnand %p252_p0, %p246_p11 }
  0x20   :  { %256 = shalt.err (!%p253_p1)
}
  0x21   :  { %s287_s0 = smov 64   ;;  %s288_s3 = smov 4  }
  0x22   :  { %31 = dma.hbm_to_vmem [thread:$0]  %s351_s1, 1024, %s307_s12, [#allocation6], %s287_s0, %s287_s0, %s288_s3  }
  0x23   :  { %279 = dma.done.wait [#allocation3], 64  }
  0x24   :  { %280 = vsyncadd [#allocation3], 4294967232 }
  0x25   :  { %281 = dma.done.wait [#allocation6], 1024  }
  0x26   :  { %282 = vsyncadd [#allocation6], 4294966272  ;;  %v289_v0 = vmov 0.0   ;;  %vm290_vm0 = vmmov 0   ;;  %v205_v1 = vld [vmem:[#allocation5] sm:$0xff]   ;;  %v206_v2 = vld [vmem:[#allocation5 + $0x8] sm:$0xff]  }
  0x27   :  { %178 = vmatprep.subr.bf16.mxu0 %v289_v0  ;;  %194 = vmatprep.mubr.msk.bf16.mxu0 %vm290_vm0, %v289_v0  ;;  %v207_v3 = vld [vmem:[#allocation5 + $0x10] sm:$0xff]   ;;  %v208_v4 = vld [vmem:[#allocation5 + $0x18] sm:$0xff]   ;;  %v209_v5 = vld [vmem:[#allocation5 + $0x20] sm:$0xff]   ;;  %s291_s1 = smov [#allocation7]  }
  0x28   :  { %179 = vmatpush3.bf16.xpose.msra.mxu0 %v205_v1  ;;  %v210_v6 = vld [vmem:[#allocation5 + $0x28] sm:$0xff]   ;;  %v211_v7 = vld [vmem:[#allocation5 + $0x30] sm:$0xff]   ;;  %v212_v8 = vld [vmem:[#allocation5 + $0x38] sm:$0xff]   ;;  %s151_s6 = sshll.u32 %s291_s1, 4  ;;  %s152_s6 = int_to_ptr.vmem [resolvable:$true] %s151_s6 }
  0x29   :  { %180 = vmatprep.subr.bf16.mxu0 %v289_v0  ;;  %v39_v9 = vld [vmem:[#allocation2] sm:$0xf]  ;;  %s257_s7 = scalar_lea.vmem %s152_s6, 128  ;;  %p262_p3 = scmp.lt.s32.totalorder %s152_s6, %s152_s6 }
  0x2a   :  { %p258_p2 = scmp.ne.s32.totalorder %s152_s6, %s257_s7  ;;  %p263_p4 = scmp.lt.s32.totalorder %s257_s7, %s257_s7 }
  0x2c   :  { %p264_p5 = por %p263_p4, %p262_p3 }
  0x2e   :  { %p265_p6 = pnand %p264_p5, %p258_p2 }
  0x30   :  { %181 = vmatpush3.bf16.xpose.msra.mxu0 %v206_v2 }
  0x31   :  { %182 = vmatprep.subr.bf16.mxu0 %v289_v0 }
  0x38   :  { %183 = vmatpush3.bf16.xpose.msra.mxu0 %v207_v3 }
  0x39   :  { %184 = vmatprep.subr.bf16.mxu0 %v289_v0 }
  0x40   :  { %185 = vmatpush3.bf16.xpose.msra.mxu0 %v208_v4 }
  0x41   :  { %186 = vmatprep.subr.bf16.mxu0 %v289_v0 }
  0x48   :  { %187 = vmatpush3.bf16.xpose.msra.mxu0 %v209_v5 }
  0x49   :  { %188 = vmatprep.subr.bf16.mxu0 %v289_v0 }
  0x50   :  { %189 = vmatpush3.bf16.xpose.msra.mxu0 %v210_v6 }
  0x51   :  { %190 = vmatprep.subr.bf16.mxu0 %v289_v0 }
  0x58   :  { %191 = vmatpush3.bf16.xpose.msra.mxu0 %v211_v7 }
  0x59   :  { %192 = vmatprep.subr.bf16.mxu0 %v289_v0 }
  0x60   :  { %193 = vmatpush3.bf16.xpose.msra.mxu0 %v212_v8 }
  0x67   :  { %195 = vmatmul.mubr.bf16.vlgmr.msra.gmra.mrb[0].mxu0 %v39_v9 }
 0x13a   :  { %v138_v10 = vpop.f32.mrb[0].mxu0 }
 0x13b   :  { %144 = vst [vmem:[#allocation7] sm:$0xff] %v138_v10  ;;  %v196_v11 = vpop.f32.mrb[1].mxu0 }
 0x13c   :  { %v141_v12 = vpop.f32.mrb[2].mxu0 }
 0x13d   :  { %268 = shalt.err (!%p265_p6)
}
 0x13e   :  { %s269_s10 = scalar_lea.hbm %s352_s2, 128 }
 0x13f   :  { %p270_p7 = scmp.ne.s32.totalorder %s352_s2, %s269_s10  ;;  %p273_p8 = scmp.lt.u32.totalorder %s269_s10, %s352_s2 }
 0x141   :  { %p275_p9 = pnand %p273_p8, %p270_p7 }
 0x143   :  { %278 = shalt.err (!%p275_p9)
}
 0x144   :  { %154 = dma.vmem_to_hbm [thread:$0]  %s152_s6, 128, %s352_s2, [#allocation4]   ;;  %v197_v13 = vpop.f32.mrb[3].mxu0 }
 0x145   :  { %283 = dma.done.wait [#allocation4], 128  }
 0x146   :  { %284 = vsyncadd [#allocation4], 4294967168 }
 0x147   :  { %158 = vsyncpa [#allocation3], 1 }
 0x148   :  { %159 = vsyncpa [#allocation6], 1 }
 0x149   :  { %160 = vsyncpa [#allocation4], 1 }

</bundles_post_ra>
